<compile_context>
chip_gen: v5e
topology: v5e:2x2
jax: 0.10.0
libtpu: 0.0.40
codegen_flags: <defaults>
</compile_context>

<pallas_src>
import functools

import jax
import jax.numpy as jnp
from jax.experimental import pallas as pl
from jax.experimental.pallas import tpu as pltpu

HID = 8      # hidden width hardcoded by nn.Linear(8, 8) in the module
LANE = 128   # TPU lane width


def _round_up(a, b):
    return (a + b - 1) // b * b


def mlp_kernel(x_ref, p_ref, o_ref):
    # x_ref: (1, bn)            batch on the lane axis
    # p_ref: (HID, HID + 5)     packed [w1 | b1 | W2 (8 cols) | b2 | w3 | b3]
    # o_ref: (1, bn)
    x = x_ref[...]                        # (1, bn)
    w1 = p_ref[:, 0:1]                    # (8, 1)
    b1 = p_ref[:, 1:2]                    # (8, 1)
    w2 = p_ref[:, 2:2 + HID]              # (8, 8)
    b2 = p_ref[:, 2 + HID:3 + HID]        # (8, 1)
    w3 = p_ref[:, 3 + HID:4 + HID]        # (8, 1)
    b3 = p_ref[0:1, 4 + HID:5 + HID]      # (1, 1)

    # Layer 1: input_dim == 1 -> outer product, pure VPU (no MXU push/pop).
    h1 = jnp.maximum(w1 * x + b1, 0.0)                               # (8, bn)

    # Layer 2: the only real matmul (8x8 @ 8xbn) -> MXU.
    h2 = jnp.dot(w2, h1, preferred_element_type=jnp.float32) + b2    # (8, bn)
    h2 = jnp.maximum(h2, 0.0)

    # Layer 3: output_dim == 1 -> weighted sublane reduce (VPU + XLU).
    y = jnp.sum(w3 * h2, axis=0, keepdims=True) + b3                 # (1, bn)
    o_ref[...] = y.astype(o_ref.dtype)


def pack_params(params):
    """Pack PyTorch-layout (out,in) weights + biases into one (8, 13) operand."""
    w1 = params["w1"].astype(jnp.float32)                       # (8, 1)
    b1 = params["b1"].reshape(HID, 1).astype(jnp.float32)       # (8, 1)
    w2 = params["w2"].astype(jnp.float32)                       # (8, 8)
    b2 = params["b2"].reshape(HID, 1).astype(jnp.float32)       # (8, 1)
    w3 = params["w3"].T.astype(jnp.float32)                     # (8, 1)
    b3 = jnp.full((HID, 1), params["b3"][0], jnp.float32)       # (8, 1) broadcasted
    return jnp.concatenate([w1, b1, w2, b2, w3, b3], axis=1)    # (8, 13)


@functools.partial(jax.jit, static_argnames=("max_tile",))
def simple_regressor_forward(x, params, *, max_tile=2048):
    """x: (N, 1) float32; params: PyTorch-layout dict. Returns (N, 1) float32."""
    N, input_dim = x.shape
    output_dim = params["w3"].shape[0]
    assert input_dim == 1 and output_dim == 1 and params["w2"].shape == (HID, HID)

    packed = pack_params(params)                  # (8, 13), single constant stream
    xt = x.T.astype(jnp.float32)                  # (1, N) -- batch on lanes

    # Lane-dense batch tiling derived from N: one fat step for small N,
    # <= max_tile columns per step for large N (bn always a multiple of 128).
    bn = min(_round_up(N, LANE), max_tile)
    n_pad = _round_up(N, bn)
    if n_pad != N:
        xt = jnp.pad(xt, ((0, 0), (0, n_pad - N)))
    grid = (n_pad // bn,)

    yt = pl.pallas_call(
        mlp_kernel,
        out_shape=jax.ShapeDtypeStruct((1, n_pad), jnp.float32),
        grid_spec=pltpu.PrefetchScalarGridSpec(
            num_scalar_prefetch=0,
            grid=grid,
            in_specs=[
                pl.BlockSpec((1, bn), lambda i: (0, i)),           # x^T tile
                pl.BlockSpec((HID, HID + 5), lambda i: (0, 0)),    # packed params
            ],
            out_specs=pl.BlockSpec((1, bn), lambda i: (0, i)),     # y^T tile
        ),
        compiler_params=pltpu.CompilerParams(
            dimension_semantics=("parallel",),
        ),
    )(xt, packed)

    return yt[:, :N].T                            # back to (N, output_dim)


def init_params(key, input_dim=1, hidden_dim=8, output_dim=1):
    """PyTorch-layout params: W is (out_features, in_features), b is (out_features,)."""
    ks = jax.random.split(key, 6)

    def u(k, shape, fan_in):
        bound = 1.0 / jnp.sqrt(jnp.float32(fan_in))
        return jax.random.uniform(k, shape, jnp.float32, -bound, bound)

    return {
        "w1": u(ks[0], (hidden_dim, input_dim), input_dim),
        "b1": u(ks[1], (hidden_dim,), input_dim),
        "w2": u(ks[2], (hidden_dim, hidden_dim), hidden_dim),
        "b2": u(ks[3], (hidden_dim,), hidden_dim),
        "w3": u(ks[4], (output_dim, hidden_dim), hidden_dim),
        "b3": u(ks[5], (output_dim,), hidden_dim),
    }


def reference_forward(x, p):
    h1 = jnp.maximum(x @ p["w1"].T + p["b1"], 0.0)
    h2 = jnp.maximum(h1 @ p["w2"].T + p["b2"], 0.0)
    return h2 @ p["w3"].T + p["b3"]


if __name__ == "__main__":
    key = jax.random.PRNGKey(0)
    kx1, kx2, kp = jax.random.split(key, 3)

    params = init_params(kp, input_dim=1, hidden_dim=HID, output_dim=1)

    # Case 1: N a multiple of 128 (single fat grid step, no padding).
    x1 = jax.random.normal(kx1, (512, 1), jnp.float32)
    out1 = jax.block_until_ready(simple_regressor_forward(x1, params))
    ref1 = reference_forward(x1, params)
    assert out1.shape == (512, 1)
    assert jnp.allclose(out1, ref1, atol=1e-5, rtol=1e-5)

    # Case 2: ragged N to exercise the lane-padding path.
    x2 = jax.random.normal(kx2, (300, 1), jnp.float32)
    out2 = jax.block_until_ready(simple_regressor_forward(x2, params))
    ref2 = reference_forward(x2, params)
    assert out2.shape == (300, 1)
    assert jnp.allclose(out2, ref2, atol=1e-5, rtol=1e-5)

    print("KERNEL_OK")
</pallas_src>

<mosaic_0001>
module attributes {stable_mosaic.version = 11 : i64} {
  func.func @mlp_kernel(%arg0: i32, %arg1: memref<1x512xf32, #tpu.memory_space<vmem>>, %arg2: memref<8x13xf32, #tpu.memory_space<vmem>>, %arg3: memref<1x512xf32, #tpu.memory_space<vmem>>) attributes {dimension_semantics = [#tpu.dimension_semantics<parallel>], iteration_bounds = array<i64: 1>, scalar_prefetch = 0 : i64, scratch_operands = 0 : i64, tpu.core_type = #tpu.core_type<tc>, window_params = [{transform_indices = @transform_0, window_bounds = array<i64: 1, 512>}, {pipeline_mode = #tpu.pipeline_mode<synchronous>, transform_indices = @transform_1, window_bounds = array<i64: 8, 13>}, {transform_indices = @transform_2, window_bounds = array<i64: 1, 512>}]} {
    %c0 = arith.constant 0 : index
    %c0_0 = arith.constant 0 : index
    %0 = vector.load %arg1[%c0, %c0_0] : memref<1x512xf32, #tpu.memory_space<vmem>>, vector<1x512xf32>
    %c0_1 = arith.constant 0 : index
    %c0_2 = arith.constant 0 : index
    %1 = vector.load %arg2[%c0_1, %c0_2] : memref<8x13xf32, #tpu.memory_space<vmem>>, vector<8x1xf32>
    %c0_3 = arith.constant 0 : index
    %c1 = arith.constant 1 : index
    %2 = vector.load %arg2[%c0_3, %c1] : memref<8x13xf32, #tpu.memory_space<vmem>>, vector<8x1xf32>
    %c0_4 = arith.constant 0 : index
    %c2 = arith.constant 2 : index
    %3 = vector.load %arg2[%c0_4, %c2] : memref<8x13xf32, #tpu.memory_space<vmem>>, vector<8x8xf32>
    %c0_5 = arith.constant 0 : index
    %c10 = arith.constant 10 : index
    %4 = vector.load %arg2[%c0_5, %c10] : memref<8x13xf32, #tpu.memory_space<vmem>>, vector<8x1xf32>
    %c0_6 = arith.constant 0 : index
    %c11 = arith.constant 11 : index
    %5 = vector.load %arg2[%c0_6, %c11] : memref<8x13xf32, #tpu.memory_space<vmem>>, vector<8x1xf32>
    %c0_7 = arith.constant 0 : index
    %c12 = arith.constant 12 : index
    %6 = vector.load %arg2[%c0_7, %c12] : memref<8x13xf32, #tpu.memory_space<vmem>>, vector<1x1xf32>
    %7 = vector.broadcast %1 : vector<8x1xf32> to vector<8x512xf32>
    %8 = vector.broadcast %0 : vector<1x512xf32> to vector<8x512xf32>
    %9 = arith.mulf %7, %8 : vector<8x512xf32>
    %10 = vector.broadcast %2 : vector<8x1xf32> to vector<8x512xf32>
    %11 = arith.addf %9, %10 : vector<8x512xf32>
    %cst = arith.constant 0.000000e+00 : f32
    %12 = vector.broadcast %cst : f32 to vector<8x512xf32>
    %13 = arith.maximumf %11, %12 : vector<8x512xf32>
    %cst_8 = arith.constant dense<0.000000e+00> : vector<8x512xf32>
    %14 = tpu.matmul %3, %13, %cst_8 {dimension_numbers = #tpu.dot_dimension_numbers<[1], [0], [0], [1], [0, 0, 1, 1], [], []>} : vector<8x8xf32>, vector<8x512xf32>, vector<8x512xf32> -> vector<8x512xf32>
    %15 = vector.broadcast %4 : vector<8x1xf32> to vector<8x512xf32>
    %16 = arith.addf %14, %15 : vector<8x512xf32>
    %cst_9 = arith.constant 0.000000e+00 : f32
    %17 = vector.broadcast %cst_9 : f32 to vector<8x512xf32>
    %18 = arith.maximumf %16, %17 : vector<8x512xf32>
    %19 = vector.broadcast %5 : vector<8x1xf32> to vector<8x512xf32>
    %20 = arith.mulf %19, %18 : vector<8x512xf32>
    %cst_10 = arith.constant dense<0.000000e+00> : vector<512xf32>
    %21 = vector.multi_reduction <add>, %20, %cst_10 [0] : vector<8x512xf32> to vector<512xf32>
    %22 = vector.shape_cast %21 : vector<512xf32> to vector<1x512xf32>
    %23 = vector.broadcast %6 : vector<1x1xf32> to vector<1x512xf32>
    %24 = arith.addf %22, %23 : vector<1x512xf32>
    %c0_11 = arith.constant 0 : index
    %c0_12 = arith.constant 0 : index
    %25 = vector.load %arg3[%c0_11, %c0_12] : memref<1x512xf32, #tpu.memory_space<vmem>>, vector<1x512xf32>
    tpu.vector_store %arg3[%c0_11, %c0_12], %24 {strides = array<i32>} : memref<1x512xf32, #tpu.memory_space<vmem>>, vector<1x512xf32>,
    return
  }
  func.func @transform_0(%arg0: i32) -> (i32, i32) {
    %c0_i32 = arith.constant 0 : i32
    %c0_i32_0 = arith.constant 0 : i32
    return %c0_i32, %arg0 : i32, i32
  }
  func.func @transform_1(%arg0: i32) -> (i32, i32) {
    %c0_i32 = arith.constant 0 : i32
    %c0_i32_0 = arith.constant 0 : i32
    %c0_i32_1 = arith.constant 0 : i32
    return %c0_i32, %c0_i32_0 : i32, i32
  }
  func.func @transform_2(%arg0: i32) -> (i32, i32) {
    %c0_i32 = arith.constant 0 : i32
    %c0_i32_0 = arith.constant 0 : i32
    return %c0_i32, %arg0 : i32, i32
  }
}

</mosaic_0001>

<bundles_post_ra>
// kernel: simple_regressor_forward.1
= control target key start
LH: loop header
LB: loop body
LE: loop exit
PB: predicated region body
PF: predicated region fallthrough
CT: control target
= control target key end

     0   :  { %s291_s0 = inlined_call_operand.vmem [shape: f32[1,512], index: 0, kind: input, shape index: {}]   ;;  %s292_s1 = inlined_call_operand.vmem [shape: f32[8,13], index: 1, kind: input, shape index: {}]   ;;  %s293_s2 = inlined_call_operand.hbm [shape: f32[1,512], index: 2, kind: output, shape index: {}]  }
   0x1   :  { %v13_v0 = vld [vmem:[%s292_s1] sm:$0xff] }
   0x2   :  { %7 = vsyncpa [#allocation3], 0  ;;  %v257_v1 = vmov 0   ;;  %s258_s11 = smov 126   ;;  %v259_v2 = vmov 1   ;;  %v260_v3 = vmov 10  }
   0x3   :  { %225 = vset.pattern.permute.xlu0 %v257_v1  ;;  %49 = vrot.lane.b32.xlu1 %v13_v0, %s258_s11  ;;  %v261_v4 = vmov 11   ;;  %v262_v5 = vmov 12   ;;  %v14_v6 = vld [vmem:[%s292_s1] sm:$0x1]  ;;  %vm51_vm0 = vcmask 64512   ;;  %vm186_vm1 = vcmask 1040384  }
   0x4   :  { %17 = vperm.xlu0 %225, %v13_v0   ;;  %227 = vset.pattern.permute.xlu1 %v260_v3  ;;  %v12_v8 = vld [vmem:[%s291_s0] sm:$0xf]  ;;  %vm188_vm2 = vcmask 1042434   ;;  %s263_s0 = smov [#allocation2]   ;;  %s205_s18 = sshll.u32 %s293_s2, 4  ;;  %vm190_vm3 = vcmask 1041408   ;;  %s206_s18 = int_to_ptr.hbm [resolvable:$true] %s205_s18 }
   0x5   :  { %228 = vset.pattern.permute.xlu2 %v261_v4  ;;  %v21_v9 = vperm.slane %v12_v8, 0  ;;  %v22_v10 = vperm.slane %v12_v8, 1  ;;  %v23_v11 = vperm.slane %v12_v8, 2  ;;  %v24_v12 = vperm.slane %v12_v8, 3  ;;  %s203_s1 = sshll.u32 %s263_s0, 4  ;;  %s204_s1 = int_to_ptr.vmem [resolvable:$true] %s203_s1 }
   0x6   :  { %139 = vperm.xlu2 %228, %v13_v0  }
   0xb   :  { %46 = vperm.xlu1 %227, %v13_v0  }
   0xc   :  { %226 = vset.pattern.permute.xlu0 %v259_v2 }
   0xd   :  { %34 = vperm.xlu0 %226, %v13_v0  }
   0xe   :  { %229 = vset.pattern.permute.xlu2 %v262_v5 }
   0xf   :  { %172 = vperm.xlu2 %229, %v14_v6  }
  0x15   :  { %230 = vset.pattern.permute.xlu0 %v262_v5 }
  0x60   :  { %v140_v32 = vpop.permute.xlu2 %139 }
  0x69   :  { %v173_v61 = vpop.permute.xlu2 %172 }
  0x75   :  { %v50_v26 = vpop.permute.xlu1 %49 }
  0x76   :  { %v18_v7 = vpop.permute.xlu0 %17 }
  0x77   :  { %v29_v13 = vmul.f32 %v21_v9, %v18_v7  ;;  %v30_v14 = vmul.f32 %v22_v10, %v18_v7  ;;  %v31_v15 = vmul.f32 %v23_v11, %v18_v7  ;;  %v32_v16 = vmul.f32 %v24_v12, %v18_v7 }
  0x78   :  { %v193_v7 = vlaneseq }
  0x7a   :  { %vm195_vm4 = vcmp.lt.s32.totalorder %v193_v7, 512 }
  0x7d   :  { %v47_v27 = vpop.permute.xlu1 %46 }
  0x7f   :  { %v35_v17 = vpop.permute.xlu0 %34 }
  0x80   :  { %v37_v18 = vadd.f32 %v35_v17, %v29_v13  ;;  %v38_v19 = vadd.f32 %v35_v17, %v30_v14  ;;  %v39_v20 = vadd.f32 %v35_v17, %v31_v15  ;;  %v40_v21 = vadd.f32 %v35_v17, %v32_v16 }
  0x82   :  { %v41_v22 = vmax.f32 %v37_v18, 0.0  ;;  %v42_v23 = vmax.f32 %v38_v19, 0.0  ;;  %v43_v24 = vmax.f32 %v39_v20, 0.0  ;;  %v44_v25 = vmax.f32 %v40_v21, 0.0 }
  0x84   :  { %69 = vmatpush.msra.mxu0 %v41_v22  ;;  %89 = vmatpush.msra.mxu1 %v42_v23 }
  0x85   :  { %109 = vmatpush.msra.mxu2 %v43_v24  ;;  %129 = vmatpush.msra.mxu3 %v44_v25 }
  0x86   :  { %214 = vmatmul.msk.f32.vlgmr.msra.gmra.mxu0 %vm51_vm0, %v50_v26  ;;  %215 = vmatmul.msk.f32.vlgmr.msra.gmra.mxu1 %vm51_vm0, %v50_v26 }
  0x87   :  { %216 = vmatmul.msk.f32.vlgmr.msra.gmra.mxu2 %vm51_vm0, %v50_v26  ;;  %217 = vmatmul.msk.f32.vlgmr.msra.gmra.mxu3 %vm51_vm0, %v50_v26 }
 0x103   :  { %v71_v28 = vpop.f32.mrf.mxu0  ;;  %v91_v29 = vpop.f32.mrf.mxu1 }
 0x104   :  { %v72_v30 = vadd.f32 %v71_v28, %v47_v27  ;;  %v92_v31 = vadd.f32 %v91_v29, %v47_v27 }
 0x106   :  { %v134_v33 = vmax.f32 %v72_v30, 0.0  ;;  %v135_v34 = vmax.f32 %v92_v31, 0.0 }
 0x108   :  { %v142_v35 = vmul.f32 %v140_v32, %v134_v33  ;;  %v143_v36 = vmul.f32 %v140_v32, %v135_v34 }
 0x10a   :  { %v146_v37 = vrot.slane %v142_v35, 4  ;;  %v152_v38 = vrot.slane %v143_v36, 4  ;;  %v111_v39 = vpop.f32.mrf.mxu2  ;;  %v131_v40 = vpop.f32.mrf.mxu3 }
 0x10b   :  { %v112_v41 = vadd.f32 %v111_v39, %v47_v27  ;;  %v132_v42 = vadd.f32 %v131_v40, %v47_v27 }
 0x10c   :  { %v147_v43 = vadd.f32 %v146_v37, %v142_v35  ;;  %v153_v44 = vadd.f32 %v152_v38, %v143_v36 }
 0x10d   :  { %v136_v45 = vmax.f32 %v112_v41, 0.0  ;;  %v137_v46 = vmax.f32 %v132_v42, 0.0 }
 0x10e   :  { %v154_v47 = vrot.slane %v153_v44, 2  ;;  %v148_v50 = vrot.slane %v147_v43, 2 }
 0x10f   :  { %v144_v48 = vmul.f32 %v140_v32, %v136_v45  ;;  %v145_v49 = vmul.f32 %v140_v32, %v137_v46 }
 0x110   :  { %v155_v51 = vadd.f32 %v154_v47, %v153_v44  ;;  %v149_v57 = vadd.f32 %v148_v50, %v147_v43 }
 0x111   :  { %v158_v52 = vrot.slane %v144_v48, 4  ;;  %v164_v53 = vrot.slane %v145_v49, 4 }
 0x112   :  { %v156_v54 = vrot.slane %v155_v51, 1  ;;  %v150_v0 = vrot.slane %v149_v57, 1 }
 0x113   :  { %v159_v55 = vadd.f32 %v158_v52, %v144_v48  ;;  %v165_v56 = vadd.f32 %v164_v53, %v145_v49 }
 0x114   :  { %v157_v60 = vadd.f32 %v156_v54, %v155_v51  ;;  %v151_v4 = vadd.f32 %v150_v0, %v149_v57 }
 0x115   :  { %v160_v58 = vrot.slane %v159_v55, 2  ;;  %v166_v59 = vrot.slane %v165_v56, 2 }
 0x116   :  { %v176_v3 = vadd.f32 %v173_v61, %v157_v60  ;;  %v175_v11 = vadd.f32 %v173_v61, %v151_v4 }
 0x117   :  { %v161_v62 = vadd.f32 %v160_v58, %v159_v55  ;;  %v167_v63 = vadd.f32 %v166_v59, %v165_v56 }
 0x118   :  { %v183_v10 = vrot.slane %v176_v3, 7 }
 0x119   :  { %v162_v1 = vrot.slane %v161_v62, 1  ;;  %v168_v2 = vrot.slane %v167_v63, 1 }
 0x11a   :  { %v187_v14 = vsel %vm186_vm1, %v175_v11, %v183_v10 }
 0x11b   :  { %v163_v5 = vadd.f32 %v162_v1, %v161_v62  ;;  %v169_v6 = vadd.f32 %v168_v2, %v167_v63 }
 0x11d   :  { %v177_v8 = vadd.f32 %v173_v61, %v163_v5  ;;  %v178_v9 = vadd.f32 %v173_v61, %v169_v6 }
 0x11f   :  { %v184_v12 = vrot.slane %v177_v8, 6  ;;  %v185_v13 = vrot.slane %v178_v9, 5 }
 0x121   :  { %v189_v15 = vsel %vm188_vm2, %v184_v12, %v185_v13 }
 0x122   :  { %v191_v16 = vsel %vm190_vm3, %v187_v14, %v189_v15 }
 0x123   :  { %197 = vst.msk [vmem:[#allocation2] sm:$0xf] %vm195_vm4, %v191_v16 }
 0x124   :  { %208 = dma.vmem_to_hbm [thread:$0]  %s204_s1, 64, %s206_s18, [#allocation3]  }
 0x125   :  { %255 = dma.done.wait [#allocation3], 64  }
 0x126   :  { %256 = vsyncadd [#allocation3], 4294967232 }
 0x127   :  { %213 = vsyncpa [#allocation3], 1 }

</bundles_post_ra>
